<compile_context>
chip_gen: v7x
topology: tpu7x:2x2x1
jax: 0.10.0
libtpu: 0.0.40
codegen_flags: <defaults>
</compile_context>

<pallas_src>
import jax
import jax.numpy as jnp
from jax.experimental import pallas as pl
from jax.experimental.pallas import tpu as pltpu


def _linear_kernel(x_ref, w_ref, b_ref, o_ref):
    # One row-tile; the (small) weight and bias are fully resident in VMEM.
    acc = jnp.dot(x_ref[...], w_ref[...], preferred_element_type=jnp.float32)
    o_ref[...] = (acc + b_ref[...]).astype(o_ref.dtype)


def _round_up(n, m):
    return ((n + m - 1) // m) * m


def _matmul_bias(x, w, b_row, *, tile_rows=2048):
    """out = x @ w + b_row, row-tiled.  x:(R,K)  w:(K,N)  b_row:(1,N)."""
    R, K = x.shape
    N = w.shape[1]

    # Row tile: as big as the data allows (memory-bound -> fewer, bigger grid
    # steps), but split at least two ways when there is enough work so the
    # "parallel" grid axis can be sharded across TensorCores (v7x megacore).
    tr = min(tile_rows, _round_up(R, 8))
    if R > 8 and R <= tr:
        tr = max(8, _round_up(pl.cdiv(R, 2), 8))
    grid = (pl.cdiv(R, tr),)  # ragged last block is fine: OOB writes are masked

    return pl.pallas_call(
        _linear_kernel,
        out_shape=jax.ShapeDtypeStruct((R, N), x.dtype),
        grid_spec=pltpu.PrefetchScalarGridSpec(
            num_scalar_prefetch=0,
            grid=grid,
            in_specs=[
                pl.BlockSpec((tr, K), lambda i: (i, 0)),
                pl.BlockSpec((K, N), lambda i: (0, 0)),
                pl.BlockSpec((1, N), lambda i: (0, 0)),
            ],
            out_specs=pl.BlockSpec((tr, N), lambda i: (i, 0)),
        ),
        compiler_params=pltpu.CompilerParams(
            dimension_semantics=("parallel",),
        ),
    )(x, w, b_row)


def _prep_linear(weight, bias):
    """Pre-transpose + lane-pack a PyTorch-layout Linear's parameters (once)."""
    out_f, in_f = weight.shape
    w_t = jnp.asarray(weight).T                      # (in_f, out_f)
    b = jnp.asarray(bias)
    pack = 128 // out_f if (out_f < 128 and 128 % out_f == 0) else 1
    params = {
        "in_f": in_f,
        "out_f": out_f,
        "pack": pack,
        "w_t": w_t,
        "b_row": b.reshape(1, out_f),
    }
    if pack > 1:
        # Block-diagonal weight: `pack` consecutive rows share one 128-lane
        # output row; kron(I, W^T) keeps the math exactly x @ W^T per row.
        params["w_packed"] = jnp.kron(jnp.eye(pack, dtype=w_t.dtype), w_t)
        params["b_packed"] = jnp.tile(b, pack).reshape(1, pack * out_f)
    return params


def pallas_linear(params, x, *, tile_rows=2048):
    """torch.nn.Linear forward (x @ W^T + b) using pre-packed params."""
    M, in_f = x.shape
    assert in_f == params["in_f"]
    out_f = params["out_f"]
    if M == 0:
        return jnp.zeros((0, out_f), x.dtype)
    pack = params["pack"]
    if pack > 1 and M % pack == 0:
        # Lane-dense path: contiguous (free) reshapes, 128-wide output blocks.
        xp = x.reshape(M // pack, pack * in_f)
        out = _matmul_bias(xp, params["w_packed"], params["b_packed"],
                           tile_rows=tile_rows)
        return out.reshape(M, out_f)
    # Fallback (M not a multiple of `pack`): plain layout, still pad-free.
    return _matmul_bias(x, params["w_t"], params["b_row"], tile_rows=tile_rows)


class EmbeddingPallas:
    """JAX/Pallas port of MARS Embedding (two independent Linear layers)."""

    def __init__(self, n_atom_feat, n_node_hidden, n_bond_feat, n_edge_hidden,
                 key=None):
        if key is None:
            key = jax.random.PRNGKey(0)
        k1, k2, k3, k4 = jax.random.split(key, 4)

        # Mimic nn.Linear's U(-1/sqrt(fan_in), 1/sqrt(fan_in)) init.
        def init_linear(kw, kb, out_f, in_f):
            bound = 1.0 / jnp.sqrt(jnp.asarray(in_f, jnp.float32))
            w = jax.random.uniform(kw, (out_f, in_f), jnp.float32, -bound, bound)
            b = jax.random.uniform(kb, (out_f,), jnp.float32, -bound, bound)
            return w, b

        self.node_w, self.node_b = init_linear(k1, k2, n_node_hidden, n_atom_feat)
        self.edge_w, self.edge_b = init_linear(k3, k4, n_edge_hidden, n_bond_feat)

        # Pre-transposed / lane-packed parameters, built once (not per forward).
        self._node_params = _prep_linear(self.node_w, self.node_b)
        self._edge_params = _prep_linear(self.edge_w, self.edge_b)

    def __call__(self, g, x_node, x_edge):
        # `g` (the graph object) is unused by the forward math, same as PyTorch.
        h_node = pallas_linear(self._node_params, x_node)
        h_edge = pallas_linear(self._edge_params, x_edge)
        return h_node, h_edge


if __name__ == "__main__":
    key = jax.random.PRNGKey(0)
    k_node, k_edge, k_extra, k_params = jax.random.split(key, 4)

    # Small, module-consistent shapes.
    n_atom_feat, n_node_hidden = 16, 32
    n_bond_feat, n_edge_hidden = 8, 32
    num_nodes, num_edges = 64, 96

    x_node = jax.random.normal(k_node, (num_nodes, n_atom_feat), jnp.float32)
    x_edge = jax.random.normal(k_edge, (num_edges, n_bond_feat), jnp.float32)

    emb = EmbeddingPallas(n_atom_feat, n_node_hidden, n_bond_feat, n_edge_hidden,
                          key=k_params)

    h_node, h_edge = emb(g=None, x_node=x_node, x_edge=x_edge)
    jax.block_until_ready((h_node, h_edge))

    # Pure-JAX reference check (lane-dense packed path).
    ref_node = x_node @ emb.node_w.T + emb.node_b
    ref_edge = x_edge @ emb.edge_w.T + emb.edge_b
    assert h_node.shape == (num_nodes, n_node_hidden)
    assert h_edge.shape == (num_edges, n_edge_hidden)
    assert jnp.allclose(h_node, ref_node, atol=1e-5, rtol=1e-5)
    assert jnp.allclose(h_edge, ref_edge, atol=1e-5, rtol=1e-5)

    # Also exercise the pad-free ragged / fallback path (rows not % 4 == 0).
    x_odd = jax.random.normal(k_extra, (37, n_atom_feat), jnp.float32)
    h_odd = pallas_linear(emb._node_params, x_odd)
    jax.block_until_ready(h_odd)
    ref_odd = x_odd @ emb.node_w.T + emb.node_b
    assert h_odd.shape == (37, n_node_hidden)
    assert jnp.allclose(h_odd, ref_odd, atol=1e-5, rtol=1e-5)

    print("KERNEL_OK")
</pallas_src>

<mosaic_0001>
module attributes {stable_mosaic.version = 11 : i64} {
  func.func @_linear_kernel(%arg0: i32, %arg1: memref<8x64xf32, #tpu.memory_space<vmem>>, %arg2: memref<64x128xf32, #tpu.memory_space<vmem>>, %arg3: memref<1x128xf32, #tpu.memory_space<vmem>>, %arg4: memref<8x128xf32, #tpu.memory_space<vmem>>) attributes {dimension_semantics = [#tpu.dimension_semantics<parallel>], iteration_bounds = array<i64: 2>, scalar_prefetch = 0 : i64, scratch_operands = 0 : i64, tpu.core_type = #tpu.core_type<tc>, window_params = [{transform_indices = @transform_0, window_bounds = array<i64: 8, 64>}, {pipeline_mode = #tpu.pipeline_mode<synchronous>, transform_indices = @transform_1, window_bounds = array<i64: 64, 128>}, {pipeline_mode = #tpu.pipeline_mode<synchronous>, transform_indices = @transform_2, window_bounds = array<i64: 1, 128>}, {transform_indices = @transform_3, window_bounds = array<i64: 8, 128>}]} {
    %c0 = arith.constant 0 : index
    %c0_0 = arith.constant 0 : index
    %0 = vector.load %arg1[%c0, %c0_0] : memref<8x64xf32, #tpu.memory_space<vmem>>, vector<8x64xf32>
    %c0_1 = arith.constant 0 : index
    %c0_2 = arith.constant 0 : index
    %1 = vector.load %arg2[%c0_1, %c0_2] : memref<64x128xf32, #tpu.memory_space<vmem>>, vector<64x128xf32>
    %cst = arith.constant dense<0.000000e+00> : vector<8x128xf32>
    %2 = tpu.matmul %0, %1, %cst {dimension_numbers = #tpu.dot_dimension_numbers<[1], [0], [0], [1], [0, 0, 1, 1], [], []>} : vector<8x64xf32>, vector<64x128xf32>, vector<8x128xf32> -> vector<8x128xf32>
    %c0_3 = arith.constant 0 : index
    %c0_4 = arith.constant 0 : index
    %3 = vector.load %arg3[%c0_3, %c0_4] : memref<1x128xf32, #tpu.memory_space<vmem>>, vector<1x128xf32>
    %4 = vector.broadcast %3 : vector<1x128xf32> to vector<8x128xf32>
    %5 = arith.addf %2, %4 : vector<8x128xf32>
    %c0_5 = arith.constant 0 : index
    %c0_6 = arith.constant 0 : index
    %6 = vector.load %arg4[%c0_5, %c0_6] : memref<8x128xf32, #tpu.memory_space<vmem>>, vector<8x128xf32>
    tpu.vector_store %arg4[%c0_5, %c0_6], %5 {strides = array<i32>} : memref<8x128xf32, #tpu.memory_space<vmem>>, vector<8x128xf32>,
    return
  }
  func.func @transform_0(%arg0: i32) -> (i32, i32) {
    %c0_i32 = arith.constant 0 : i32
    %c0_i32_0 = arith.constant 0 : i32
    return %arg0, %c0_i32 : i32, i32
  }
  func.func @transform_1(%arg0: i32) -> (i32, i32) {
    %c0_i32 = arith.constant 0 : i32
    %c0_i32_0 = arith.constant 0 : i32
    %c0_i32_1 = arith.constant 0 : i32
    return %c0_i32, %c0_i32_0 : i32, i32
  }
  func.func @transform_2(%arg0: i32) -> (i32, i32) {
    %c0_i32 = arith.constant 0 : i32
    %c0_i32_0 = arith.constant 0 : i32
    %c0_i32_1 = arith.constant 0 : i32
    return %c0_i32, %c0_i32_0 : i32, i32
  }
  func.func @transform_3(%arg0: i32) -> (i32, i32) {
    %c0_i32 = arith.constant 0 : i32
    %c0_i32_0 = arith.constant 0 : i32
    return %arg0, %c0_i32 : i32, i32
  }
}

</mosaic_0001>

<bundles_post_ra>
// kernel: tpu_custom_call.1
= control target key start
LH: loop header
LB: loop body
LE: loop exit
PB: predicated region body
PF: predicated region fallthrough
CT: control target
= control target key end

     0   :  { %8 = vsyncpa [#allocation3], 0  ;;  %s865_s0 = inlined_call_operand.hbm [shape: f32[16,64], index: 0, kind: input, shape index: {}]   ;;  %s866_s1 = inlined_call_operand.hbm [shape: f32[64,128], index: 1, kind: input, shape index: {}]   ;;  %s867_s2 = inlined_call_operand.vmem [shape: f32[1,128], index: 2, kind: input, shape index: {}]   ;;  %s868_s3 = inlined_call_operand.hbm [shape: f32[16,128], index: 3, kind: output, shape index: {}]  }
   0x1   :  { %10 = vsyncpa [#allocation3 + $0x1], 0 }
   0x2   :  { %11 = vsyncpa [#allocation6], 0 }
   0x3   :  { %12 = vsyncpa [#allocation4], 0 }
   0x4   :  { %14 = vsyncpa [#allocation4 + $0x1], 0  ;;  %s662_s12 = smov 0   ;;  %s664_s13 = smov 0  }
   0x5   :  { %s666_s14 = smov 0   ;;  %s668_s15 = smov 0  }
   0x6 LB: > { %s683_s16 = sadd.s32 4294967295, %s632_s15   ;;  %s386_s17 = sadd.s32 4294967294, %s632_s15   ;;  %s632_s15 = sphi %s668_s15, %s888_s15   ;;  %s628_s14 = sphi %s666_s14, %s887_s14   ;;  %s624_s13 = sphi %s664_s13, %s886_s13   ;;  %s620_s12 = sphi %s662_s12, %s885_s12  }
   0x7   : > { %p40_p0 = scmp.ne.s32.totalorder %s624_s13, %s620_s12  ;;  %p869_p1 = scmp.eq.s32.totalorder %s683_s16, 0 }
   0x8   : > { %p112_p3 = scmp.eq.s32.totalorder %s386_s17, 1  ;;  %p387_p5 = scmp.ge.s32.totalorder %s632_s15, 1 }
   0x9   : > { %p692_p4 = por %p869_p1, %p40_p0  ;;  %p119_p7 = scmp.lt.s32.totalorder %s632_s15, 3 }
   0xa   : > { %p697_p6 = por %p112_p3, %p40_p0  ;;  %s634_s21 = smov [#allocation5]  }
   0xb   : > { %s872_s18 = scalar_select %p692_p4, 1, 0 }
   0xc   : > { %s873_s19 = scalar_select %p697_p6, 1, 0 }
   0xd   : > { %p702_p8 = pnand %p387_p5, %p119_p7  ;;  %s131_s22 = sshll.u32 %s634_s21, 4  ;;  %s706_s22 = int_to_ptr.vmem [resolvable:$true] %s131_s22 }
   0xe   : > { %s718_s24 = sadd.s32 1, %s632_s15   ;;  %s27_s25 = sadd.s32 1, %s628_s14 }
   0xf   : > { %s874_s20 = scalar_select %p702_p8, 1, 0 }
  0x10   : > { %p450_p9 = pneg %p702_p8  ;;  %s24_s26 = ssub.s32 %s632_s15, %s718_s24 }
  0x11   : > { %s504_s29 = scalar_lea.hbm %s866_s1, 1024 }
  0x12   : > { %p713_p11 = pnand %p450_p9, %p869_p1  ;;  %p505_p12 = scmp.ne.s32.totalorder %s866_s1, %s504_s29 }
  0x13   : > { %p511_p5 = scmp.lt.u32.totalorder %s504_s29, %s866_s1 }
  0x14   : > { %p506_p13 = pneg %p713_p11 }
  0x16   : > { %p507_p0 = pnand %p506_p13, %p505_p12 }
  0x18   : > { %p508_p3 = pneg %p507_p0 }
  0x1a   : > { %p513_p7 = pnand %p511_p5, %p508_p3 }
  0x1c   : > { %516 = shalt.err (!%p513_p7)
}
  0x1d   : > { %s517_s7 = scalar_lea.vmem %s706_s22, 1024  ;;  %p525_p2 = scmp.lt.s32.totalorder %s706_s22, %s706_s22 }
  0x1e   : > { %p518_p9 = scmp.ne.s32.totalorder %s706_s22, %s517_s7  ;;  %p526_p6 = scmp.lt.s32.totalorder %s517_s7, %s517_s7 }
  0x20   : > { %p520_p10 = pnand %p518_p9, %p506_p13  ;;  %p527_p4 = por %p526_p6, %p525_p2 }
  0x22   : > { %p521_p1 = pneg %p520_p10 }
  0x24   : > { %p528_p8 = pnand %p527_p4, %p521_p1 }
  0x26   : > { %531 = shalt.err (!%p528_p8)
}
  0x27   : > { %s635_s8 = smov 128   ;;  %s636_s9 = smov 8  }
  0x28   : > { %453 = dma.hbm_to_vmem [thread:$0]  (!%p713_p11), %s866_s1, 1024, %s706_s22, [#allocation6], %s635_s8, %s635_s8, %s636_s9  }
  0x29   : > { %p25_p2 = scmp.eq.s32.totalorder %s24_s26, 0  ;;  %p34_p1 = scmp.ne.s32.totalorder %s628_s14, %s624_s13 }
  0x2a   : > { %p35_p4 = scmp.eq.s32.totalorder %s632_s15, 0  ;;  %p463_p6 = scmp.lt.s32.totalorder %s632_s15, 2 }
  0x2b   : > { %s749_s17 = scalar_select %p25_p2, %s628_s14, %s27_s25  }
  0x2c   : > { %p36_p8 = por %p35_p4, %p34_p1  ;;  %p876_p10 = scmp.eq.s32.totalorder %s683_s16, 1 }
  0x2d   : > { %s148_s27 = sand.u32 1, %s628_s14   ;;  %s391_s28 = sshll.u32 %s632_s15, 7 }
  0x2e   : > { %p753_p12 = por %p876_p10, %p34_p1  ;;  %s390_s29 = sshll.u32 %s148_s27, 3 }
  0x2f   : > { %s762_s4 = scalar_lea.hbm %s865_s0, %s391_s28  ;;  %s152_s22 = scalar_lea.vmem [#allocation2], %s390_s29 }
  0x30   : > { %s159_s25 = sshll.u32 %s152_s22, 4  ;;  %p764_p11 = pnand %p463_p6, %p36_p8  ;;  %s768_s25 = int_to_ptr.vmem [resolvable:$true] %s159_s25 }
  0x31   : > { %s149_s5 = scalar_lea.sflag [#allocation3], %s148_s27  ;;  %s532_s6 = scalar_lea.hbm %s762_s4, 128 }
  0x32   : > { %p533_p13 = scmp.ne.s32.totalorder %s762_s4, %s532_s6  ;;  %p534_p0 = pneg %p764_p11 }
  0x33   : > { %s537_s9 = scalar_lea.hbm %s865_s0, 256  ;;  %p538_p7 = scmp.lt.u32.totalorder %s762_s4, %s865_s0 }
  0x34   : > { %p535_p3 = pnand %p534_p0, %p533_p13  ;;  %p539_p9 = scmp.lt.u32.totalorder %s537_s9, %s532_s6 }
  0x35   : > { %p541_p1 = scmp.lt.u32.totalorder %s532_s6, %s762_s4 }
  0x36   : > { %p536_p5 = pneg %p535_p3  ;;  %p540_p2 = por %p539_p9, %p538_p7 }
  0x38   : > { %p542_p4 = por %p541_p1, %p540_p2 }
  0x3a   : > { %p543_p6 = pnand %p542_p4, %p536_p5 }
  0x3c   : > { %546 = shalt.err (!%p543_p6)
}
  0x3d   : > { %s547_s27 = scalar_lea.vmem %s768_s25, 128  ;;  %s637_s28 = smov [#allocation2]  }
  0x3e   : > { %p548_p8 = scmp.ne.s32.totalorder %s768_s25, %s547_s27  ;;  %s552_s29 = sshll.u32 %s637_s28, 4  ;;  %s553_s29 = int_to_ptr.vmem [resolvable:$false] %s552_s29 }
  0x3f   : > { %s554_s23 = scalar_lea.vmem %s553_s29, 256  ;;  %p555_p3 = scmp.lt.s32.totalorder %s768_s25, %s553_s29 }
  0x40   : > { %p550_p10 = pnand %p548_p8, %p534_p0  ;;  %p556_p7 = scmp.lt.s32.totalorder %s554_s23, %s547_s27 }
  0x42   : > { %p551_p13 = pneg %p550_p10  ;;  %p557_p9 = por %p556_p7, %p555_p3 }
  0x44   : > { %p558_p2 = pnand %p557_p9, %p551_p13 }
  0x46   : > { %561 = shalt.err (!%p558_p2)
}
  0x47   : > { %457 = dma.hbm_to_vmem [thread:$0]  (!%p764_p11), %s762_s4, 128, %s768_s25, %s149_s5  }
  0x48   : > { %p879_p5 = scmp.ne.s32.totalorder %s874_s20, 0 }
  0x49   : > { %s798_s30 = sand.u32 (!%p879_p5), 1, %s624_s13   ;;  %p880_p0 = scmp.ne.s32.totalorder (!%p879_p5), %s872_s18, 0 }
  0x4a   : > { %168 = sbr.rel (%p879_p5) target bundleno = 331 (0x14b), region = 32  ;;  %s393_s22 = sshll.u32 (!%p879_p5), %s798_s30, 3 }
  0x4b   : > { %s171_s6 = scalar_lea.sflag (!%p879_p5), [#allocation3], %s798_s30  ;;  %s174_s7 = scalar_lea.vmem (!%p879_p5), [#allocation2], %s393_s22 }
  0x51   : > { %607 = dma.done.wait (%p880_p0), %s171_s6, 128  }
  0x52   : > { %609 = vsyncadd (%p880_p0), %s171_s6, 4294967168  ;;  %p881_p11 = scmp.eq.s32.totalorder %s683_s16, 0 }
  0x54   : > { %611 = dma.done.wait (%p881_p11), [#allocation6], 1024   ;;  %p882_p1 = pmov %p881_p11 }
  0x55   : > { %v638_v0 = vmov 0.0|0.0   ;;  %vm639_vm0 = vmmov 0   ;;  %v640_v1 = vmov 0.0   ;;  %v202_v2 = vld [vmem:[#allocation5] sm:$0xff]  ;;  %v203_v3 = vld [vmem:[#allocation5 + $0x8] sm:$0xff]  ;;  %v204_v4 = vld [vmem:[#allocation5 + $0x10] sm:$0xff] }
  0x56   : > { %613 = vsyncadd (%p882_p1), [#allocation6], 4294966272  ;;  %430 = vmatprep.subr.bf16.mxu0 %v638_v0  ;;  %427 = vmatprep.mubr.msk.f32.mxu0 %vm639_vm0, %v640_v1  ;;  %v431_v5 = vpack.c.bf16 %v203_v3, %v202_v2  ;;  %v205_v6 = vld [vmem:[#allocation5 + $0x18] sm:$0xff]  ;;  %v206_v8 = vld [vmem:[#allocation5 + $0x20] sm:$0xff]  ;;  %vm217_vm1 = vcmask 523264   ;;  %s399_s4 = sshll.u32 %s683_s16, 7 }
  0x57   : > { %v434_v7 = vpack.c.bf16 %v205_v6, %v204_v4  ;;  %v207_v9 = vld [vmem:[#allocation5 + $0x28] sm:$0xff]  ;;  %v208_v11 = vld [vmem:[#allocation5 + $0x30] sm:$0xff]  ;;  %v209_v12 = vld [vmem:[#allocation5 + $0x38] sm:$0xff]  ;;  %s200_s25 = scalar_lea.vmem [#allocation7], %s393_s22  ;;  %s821_s9 = scalar_lea.hbm %s868_s3, %s399_s4 }
  0x58   : > { %432 = vmatpush3.bf16.msra.mxu0 %v431_v5  ;;  %v437_v10 = vpack.c.bf16 %v207_v9, %v206_v8  ;;  %v440_v13 = vpack.c.bf16 %v209_v12, %v208_v11  ;;  %v201_v14 = vld [vmem:[%s174_s7] sm:$0xff]  ;;  %s306_s26 = sshll.u32 %s200_s25, 4  ;;  %s293_s10 = scalar_lea.sflag [#allocation4], %s798_s30  ;;  %s823_s26 = int_to_ptr.vmem [resolvable:$true] %s306_s26 }
  0x59   : > { %433 = vmatprep.subr.bf16.mxu0 %v638_v0  ;;  %v396_v15 = vld [vmem:[%s867_s2] ss:$0 sm:$0xff]  ;;  %s562_s11 = scalar_lea.vmem %s823_s26, 128  ;;  %s641_s16 = smov [#allocation7]  }
  0x5a   : > { %p563_p4 = scmp.ne.s32.totalorder %s823_s26, %s562_s11  ;;  %s566_s27 = sshll.u32 %s641_s16, 4  ;;  %s567_s27 = int_to_ptr.vmem [resolvable:$false] %s566_s27 }
  0x5b   : > { %s568_s28 = scalar_lea.vmem %s567_s27, 256  ;;  %p569_p10 = scmp.lt.s32.totalorder %s823_s26, %s567_s27 }
  0x5c   : > { %435 = vmatpush3.bf16.msra.mxu0 %v434_v7  ;;  %p564_p6 = pnand %p563_p4, %p753_p12  ;;  %p570_p13 = scmp.lt.s32.totalorder %s568_s28, %s562_s11 }
  0x5d   : > { %436 = vmatprep.subr.bf16.mxu0 %v638_v0 }
  0x5e   : > { %p565_p8 = pneg %p564_p6  ;;  %p571_p3 = por %p570_p13, %p569_p10 }
  0x60   : > { %438 = vmatpush3.bf16.msra.mxu0 %v437_v10  ;;  %p572_p7 = pnand %p571_p3, %p565_p8 }
  0x61   : > { %439 = vmatprep.subr.bf16.mxu0 %v638_v0 }
  0x64   : > { %441 = vmatpush3.bf16.msra.mxu0 %v440_v13 }
  0x67   : > { %428 = vmatmul.mubr.msk.f32.vlgmr.msra.gmra.mrb[0].mxu0 %vm217_vm1, %v201_v14 }
 0x13a   : > { %v287_v16 = vpop.f32.mrb[0].mxu0 }
 0x13b   : > { %v288_v17 = vadd.f32 %v396_v15, %v287_v16  ;;  %v429_v18 = vpop.f32.mrb[1].mxu0 }
 0x13d   : > { %291 = vst [vmem:[%s200_s25] sm:$0xff] %v288_v17 }
 0x13e   : > { %575 = shalt.err (!%p572_p7)
}
 0x13f   : > { %s576_s29 = scalar_lea.hbm %s821_s9, 128  ;;  %s580_s22 = scalar_lea.hbm %s868_s3, 256 }
 0x140   : > { %p577_p9 = scmp.ne.s32.totalorder %s821_s9, %s576_s29  ;;  %p581_p0 = scmp.lt.u32.totalorder %s821_s9, %s868_s3 }
 0x141   : > { %p582_p11 = scmp.lt.u32.totalorder %s580_s22, %s576_s29  ;;  %p584_p4 = scmp.lt.u32.totalorder %s576_s29, %s821_s9 }
 0x142   : > { %p578_p2 = pnand %p577_p9, %p753_p12 }
 0x143   : > { %p583_p1 = por %p582_p11, %p581_p0 }
 0x144   : > { %p579_p5 = pneg %p578_p2 }
 0x145   : > { %p585_p6 = por %p584_p4, %p583_p1 }
 0x147   : > { %p586_p8 = pnand %p585_p6, %p579_p5 }
 0x149   : > { %589 = shalt.err (!%p586_p8)
}
 0x14a   : > { %448 = dma.vmem_to_hbm [thread:$0]  (%p753_p12), %s823_s26, 128, %s821_s9, %s293_s10  }
 0x14b PF: > { %s318_s18 = sand.u32 1, %s620_s12   ;;  %p883_p10 = scmp.ne.s32.totalorder %s873_s19, 0 }
 0x14c   : > { %p884_p13 = scmp.ge.s32.totalorder %s632_s15, 2  ;;  %s319_s20 = scalar_lea.sflag [#allocation4], %s318_s18 }
 0x14e   : > { %p459_p3 = pnand %p884_p13, %p883_p10 }
 0x150   : > { %615 = dma.done.wait (!%p459_p3), %s319_s20, 128  }
 0x151   : > { %617 = vsyncadd (!%p459_p3), %s319_s20, 4294967168  ;;  %p17_p7 = scmp.ge.s32.totalorder %s718_s24, 4   ;;  %s885_s12 = smov %s624_s13 }
 0x152   : > { %s886_s13 = smov %s628_s14  ;;  %s887_s14 = smov %s749_s17 }
 0x153   : > { %s888_s15 = smov %s718_s24  ;;  %19 = sbr.rel (!%p17_p7) target bundleno = 6 (0x6), region = 81 }
 0x15a   :  { %324 = vsyncpa [#allocation3], 1 }
 0x15b   :  { %326 = vsyncpa [#allocation3 + $0x1], 1 }
 0x15c   :  { %327 = vsyncpa [#allocation6], 1 }
 0x15d   :  { %328 = vsyncpa [#allocation4], 1 }
 0x15e   :  { %330 = vsyncpa [#allocation4 + $0x1], 1 }

</bundles_post_ra>
